<compile_context>
chip_gen: v6e
topology: v6e:2x2x1
jax: 0.10.0
libtpu: 0.0.40
codegen_flags: <defaults>
</compile_context>

<pallas_src>
import functools

import jax
import jax.numpy as jnp
from jax.experimental import pallas as pl
from jax.experimental.pallas import tpu as pltpu


def actor_kernel(obs_ref, w1_ref, b1_ref, w2_ref, b2_ref, w3_ref, b3_ref,
                 out_ref):
    """One batch-tile forward in transposed (lane-dense) layout.

    obs_ref: [obs_dim, blk]   (batch on lanes)
    wK_ref:  [out_k, in_k]    (PyTorch nn.Linear layout)
    bK_ref:  [out_k, 1]
    out_ref: [act_dim, blk]
    """
    # Hidden layer 1: ReLU(W1 @ x + b1)   (MXU matmul, f32 accumulate)
    h1 = jnp.dot(w1_ref[...], obs_ref[...], preferred_element_type=jnp.float32)
    h1 = jnp.maximum(h1 + b1_ref[...], 0.0)

    # Hidden layer 2: ReLU(W2 @ h1 + b2)
    h2 = jnp.dot(w2_ref[...], h1.astype(w2_ref.dtype),
                 preferred_element_type=jnp.float32)
    h2 = jnp.maximum(h2 + b2_ref[...], 0.0)

    # Output layer (Identity activation): logits = W3 @ h2 + b3  -> [act, blk]
    logits = jnp.dot(w3_ref[...], h2.astype(w3_ref.dtype),
                     preferred_element_type=jnp.float32) + b3_ref[...]

    # Softmax over the action dimension (sublane axis 0), numerically stable.
    m = jnp.max(logits, axis=0, keepdims=True)          # [1, blk]  (XLU reduce)
    e = jnp.exp(logits - m)                              # EUP
    s = jnp.sum(e, axis=0, keepdims=True)                # [1, blk]

    # EUP approximate reciprocal + one Newton-Raphson step (~1e-6 rel accuracy).
    r = pl.reciprocal(s, approx=True)
    r = r * (2.0 - s * r)
    p = e * r

    # clamp(min=1e-20, max=1 - 1e-20)
    out_ref[...] = jnp.clip(p, 1e-20, 1.0 - 1e-20).astype(out_ref.dtype)


def _round_up(x, m):
    return ((x + m - 1) // m) * m


def _jax_forward(obs, params):
    """Fused XLA path (also serves as the correctness reference)."""
    w1, b1, w2, b2, w3, b3 = params
    h1 = jnp.maximum(obs @ w1.T + b1, 0.0)
    h2 = jnp.maximum(h1 @ w2.T + b2, 0.0)
    logits = h2 @ w3.T + b3
    p = jax.nn.softmax(logits, axis=1)
    return jnp.clip(p, 1e-20, 1.0 - 1e-20)


@functools.partial(jax.jit,
                   static_argnames=("block_b", "min_pallas_batch",
                                    "use_bf16_inputs"))
def actor_forward(obs, params, block_b=1024, min_pallas_batch=64,
                  use_bf16_inputs=False):
    """Actor forward: a_prob = clamp(softmax(MLP(obs)), 1e-20, 1-1e-20)."""
    w1, b1, w2, b2, w3, b3 = params
    batch, obs_dim = obs.shape
    h1_dim = w1.shape[0]
    h2_dim = w2.shape[0]
    act_dim = w3.shape[0]

    # Tiny batches (e.g. single-step SAC action selection): the pallas_call is
    # pure launch + DMA overhead, so use the fused XLA path.
    if batch < min_pallas_batch:
        return _jax_forward(obs, params)

    # Lane-dense layout requires the batch tile to be a multiple of 128.
    blk = _round_up(min(block_b, batch), 128)
    # Keep >=2 grid steps so ("parallel",) can shard across both v7x
    # TensorCores; no effect on single-TC v5e/v6e.
    blk = min(blk, max(128, _round_up(pl.cdiv(batch, 2), 128)))
    batch_p = _round_up(batch, blk)
    grid = (batch_p // blk,)

    # Pad batch with zero rows, then transpose so batch sits on the lane axis
    # (wrapper-side layout plumbing; padded columns produce finite softmax
    # values and are sliced away below).
    obs_t = jnp.pad(obs, ((0, batch_p - batch), (0, 0))).T    # [obs_dim, batch_p]

    b1c = b1.reshape(h1_dim, 1)
    b2c = b2.reshape(h2_dim, 1)
    b3c = b3.reshape(act_dim, 1)

    if use_bf16_inputs:
        # Optional v6e/v7x fast path: bf16 MXU inputs, f32 accumulate.
        # Shifts numerics ~1e-3 vs the f32 PyTorch reference.
        obs_t = obs_t.astype(jnp.bfloat16)
        w1m, w2m, w3m = (w.astype(jnp.bfloat16) for w in (w1, w2, w3))
    else:
        w1m, w2m, w3m = w1, w2, w3

    # Advisory cost for XLA scheduling around the custom call.
    flops = 2 * batch_p * (obs_dim * h1_dim + h1_dim * h2_dim
                           + h2_dim * act_dim)
    in_bytes = sum(int(a.size) * a.dtype.itemsize
                   for a in (obs_t, w1m, b1c, w2m, b2c, w3m, b3c))
    bytes_accessed = in_bytes + 4 * batch_p * act_dim
    cost = pl.CostEstimate(flops=flops,
                           transcendentals=batch_p * act_dim,
                           bytes_accessed=bytes_accessed)

    const = lambda i: (0, 0)       # weights/biases: VMEM-resident every step
    batched = lambda i: (0, i)     # obs / out: march along the (lane) batch axis

    out_t = pl.pallas_call(
        actor_kernel,
        out_shape=jax.ShapeDtypeStruct((act_dim, batch_p), jnp.float32),
        grid=grid,
        in_specs=[
            pl.BlockSpec((obs_dim, blk), batched),
            pl.BlockSpec((h1_dim, obs_dim), const),
            pl.BlockSpec((h1_dim, 1), const),
            pl.BlockSpec((h2_dim, h1_dim), const),
            pl.BlockSpec((h2_dim, 1), const),
            pl.BlockSpec((act_dim, h2_dim), const),
            pl.BlockSpec((act_dim, 1), const),
        ],
        out_specs=pl.BlockSpec((act_dim, blk), batched),
        compiler_params=pltpu.CompilerParams(
            dimension_semantics=("parallel",)),
        cost_estimate=cost,
    )(obs_t, w1m, b1c, w2m, b2c, w3m, b3c)

    # Back to [batch, act_dim].
    return out_t[:, :batch].T


def init_linear(key, fan_in, fan_out):
    """PyTorch nn.Linear-style init/layout: W [out, in], b [out]."""
    kw, kb = jax.random.split(key)
    bound = float(fan_in) ** -0.5
    w = jax.random.uniform(kw, (fan_out, fan_in), jnp.float32, -bound, bound)
    b = jax.random.uniform(kb, (fan_out,), jnp.float32, -bound, bound)
    return w, b


if __name__ == "__main__":
    # Shapes consistent with the module: obs_dim=32, hidden=(64, 64), act_dim=16.
    # Batch of 256 exercises the lane-dense batch grid (2 tiles of 128 lanes).
    batch, obs_dim, h1, h2, act_dim = 256, 32, 64, 64, 16

    key = jax.random.PRNGKey(0)
    k_obs, k1, k2, k3 = jax.random.split(key, 4)

    obs = jax.random.normal(k_obs, (batch, obs_dim), jnp.float32)
    w1, b1 = init_linear(k1, obs_dim, h1)
    w2, b2 = init_linear(k2, h1, h2)
    w3, b3 = init_linear(k3, h2, act_dim)
    params = (w1, b1, w2, b2, w3, b3)

    a_prob = actor_forward(obs, params)
    a_prob = jax.block_until_ready(a_prob)

    ref = _jax_forward(obs, params)
    assert a_prob.shape == (batch, act_dim)
    assert jnp.allclose(a_prob, ref, atol=1e-5, rtol=1e-5), "mismatch vs reference"
    assert jnp.allclose(jnp.sum(a_prob, axis=1), 1.0, atol=1e-5), "rows must sum to 1"

    print("KERNEL_OK")
</pallas_src>

<mosaic_0001>
module attributes {stable_mosaic.version = 11 : i64} {
  func.func @actor_kernel(%arg0: i32, %arg1: memref<32x128xf32, #tpu.memory_space<vmem>>, %arg2: memref<64x32xf32, #tpu.memory_space<vmem>>, %arg3: memref<64x1xf32, #tpu.memory_space<vmem>>, %arg4: memref<64x64xf32, #tpu.memory_space<vmem>>, %arg5: memref<64x1xf32, #tpu.memory_space<vmem>>, %arg6: memref<16x64xf32, #tpu.memory_space<vmem>>, %arg7: memref<16x1xf32, #tpu.memory_space<vmem>>, %arg8: memref<16x128xf32, #tpu.memory_space<vmem>>) attributes {dimension_semantics = [#tpu.dimension_semantics<parallel>], iteration_bounds = array<i64: 2>, scalar_prefetch = 0 : i64, scratch_operands = 0 : i64, tpu.core_type = #tpu.core_type<tc>, window_params = [{transform_indices = @transform_0, window_bounds = array<i64: 32, 128>}, {pipeline_mode = #tpu.pipeline_mode<synchronous>, transform_indices = @transform_1, window_bounds = array<i64: 64, 32>}, {pipeline_mode = #tpu.pipeline_mode<synchronous>, transform_indices = @transform_2, window_bounds = array<i64: 64, 1>}, {pipeline_mode = #tpu.pipeline_mode<synchronous>, transform_indices = @transform_3, window_bounds = array<i64: 64, 64>}, {pipeline_mode = #tpu.pipeline_mode<synchronous>, transform_indices = @transform_4, window_bounds = array<i64: 64, 1>}, {pipeline_mode = #tpu.pipeline_mode<synchronous>, transform_indices = @transform_5, window_bounds = array<i64: 16, 64>}, {pipeline_mode = #tpu.pipeline_mode<synchronous>, transform_indices = @transform_6, window_bounds = array<i64: 16, 1>}, {transform_indices = @transform_7, window_bounds = array<i64: 16, 128>}]} {
    %c0 = arith.constant 0 : index
    %c0_0 = arith.constant 0 : index
    %0 = vector.load %arg2[%c0, %c0_0] : memref<64x32xf32, #tpu.memory_space<vmem>>, vector<64x32xf32>
    %c0_1 = arith.constant 0 : index
    %c0_2 = arith.constant 0 : index
    %1 = vector.load %arg1[%c0_1, %c0_2] : memref<32x128xf32, #tpu.memory_space<vmem>>, vector<32x128xf32>
    %cst = arith.constant dense<0.000000e+00> : vector<64x128xf32>
    %2 = tpu.matmul %0, %1, %cst {dimension_numbers = #tpu.dot_dimension_numbers<[1], [0], [0], [1], [0, 0, 1, 1], [], []>} : vector<64x32xf32>, vector<32x128xf32>, vector<64x128xf32> -> vector<64x128xf32>
    %c0_3 = arith.constant 0 : index
    %c0_4 = arith.constant 0 : index
    %3 = vector.load %arg3[%c0_3, %c0_4] : memref<64x1xf32, #tpu.memory_space<vmem>>, vector<64x1xf32>
    %4 = vector.broadcast %3 : vector<64x1xf32> to vector<64x128xf32>
    %5 = arith.addf %2, %4 : vector<64x128xf32>
    %cst_5 = arith.constant 0.000000e+00 : f32
    %6 = vector.broadcast %cst_5 : f32 to vector<64x128xf32>
    %7 = arith.maximumf %5, %6 : vector<64x128xf32>
    %c0_6 = arith.constant 0 : index
    %c0_7 = arith.constant 0 : index
    %8 = vector.load %arg4[%c0_6, %c0_7] : memref<64x64xf32, #tpu.memory_space<vmem>>, vector<64x64xf32>
    %cst_8 = arith.constant dense<0.000000e+00> : vector<64x128xf32>
    %9 = tpu.matmul %8, %7, %cst_8 {dimension_numbers = #tpu.dot_dimension_numbers<[1], [0], [0], [1], [0, 0, 1, 1], [], []>} : vector<64x64xf32>, vector<64x128xf32>, vector<64x128xf32> -> vector<64x128xf32>
    %c0_9 = arith.constant 0 : index
    %c0_10 = arith.constant 0 : index
    %10 = vector.load %arg5[%c0_9, %c0_10] : memref<64x1xf32, #tpu.memory_space<vmem>>, vector<64x1xf32>
    %11 = vector.broadcast %10 : vector<64x1xf32> to vector<64x128xf32>
    %12 = arith.addf %9, %11 : vector<64x128xf32>
    %cst_11 = arith.constant 0.000000e+00 : f32
    %13 = vector.broadcast %cst_11 : f32 to vector<64x128xf32>
    %14 = arith.maximumf %12, %13 : vector<64x128xf32>
    %c0_12 = arith.constant 0 : index
    %c0_13 = arith.constant 0 : index
    %15 = vector.load %arg6[%c0_12, %c0_13] : memref<16x64xf32, #tpu.memory_space<vmem>>, vector<16x64xf32>
    %cst_14 = arith.constant dense<0.000000e+00> : vector<16x128xf32>
    %16 = tpu.matmul %15, %14, %cst_14 {dimension_numbers = #tpu.dot_dimension_numbers<[1], [0], [0], [1], [0, 0, 1, 1], [], []>} : vector<16x64xf32>, vector<64x128xf32>, vector<16x128xf32> -> vector<16x128xf32>
    %c0_15 = arith.constant 0 : index
    %c0_16 = arith.constant 0 : index
    %17 = vector.load %arg7[%c0_15, %c0_16] : memref<16x1xf32, #tpu.memory_space<vmem>>, vector<16x1xf32>
    %18 = vector.broadcast %17 : vector<16x1xf32> to vector<16x128xf32>
    %19 = arith.addf %16, %18 : vector<16x128xf32>
    %cst_17 = arith.constant dense<0xFF800000> : vector<128xf32>
    %20 = vector.multi_reduction <maximumf>, %19, %cst_17 [0] : vector<16x128xf32> to vector<128xf32>
    %21 = vector.shape_cast %20 : vector<128xf32> to vector<1x128xf32>
    %22 = vector.broadcast %21 : vector<1x128xf32> to vector<16x128xf32>
    %23 = arith.subf %19, %22 : vector<16x128xf32>
    %24 = math.exp %23 : vector<16x128xf32>
    %cst_18 = arith.constant dense<0.000000e+00> : vector<128xf32>
    %25 = vector.multi_reduction <add>, %24, %cst_18 [0] : vector<16x128xf32> to vector<128xf32>
    %26 = vector.shape_cast %25 : vector<128xf32> to vector<1x128xf32>
    %27 = tpu.reciprocal %26 {approx = true} : vector<1x128xf32> -> vector<1x128xf32>
    %28 = arith.mulf %26, %27 : vector<1x128xf32>
    %cst_19 = arith.constant 2.000000e+00 : f32
    %29 = vector.broadcast %cst_19 : f32 to vector<1x128xf32>
    %30 = arith.subf %29, %28 : vector<1x128xf32>
    %31 = arith.mulf %27, %30 : vector<1x128xf32>
    %32 = vector.broadcast %31 : vector<1x128xf32> to vector<16x128xf32>
    %33 = arith.mulf %24, %32 : vector<16x128xf32>
    %cst_20 = arith.constant 9.99999968E-21 : f32
    %cst_21 = arith.constant 1.000000e+00 : f32
    %34 = vector.broadcast %cst_20 : f32 to vector<16x128xf32>
    %35 = arith.maximumf %34, %33 : vector<16x128xf32>
    %36 = vector.broadcast %cst_21 : f32 to vector<16x128xf32>
    %37 = arith.minimumf %36, %35 : vector<16x128xf32>
    %c0_22 = arith.constant 0 : index
    %c0_23 = arith.constant 0 : index
    %38 = vector.load %arg8[%c0_22, %c0_23] : memref<16x128xf32, #tpu.memory_space<vmem>>, vector<16x128xf32>
    tpu.vector_store %arg8[%c0_22, %c0_23], %37 {strides = array<i32>} : memref<16x128xf32, #tpu.memory_space<vmem>>, vector<16x128xf32>,
    return
  }
  func.func @transform_0(%arg0: i32) -> (i32, i32) {
    %c0_i32 = arith.constant 0 : i32
    %c0_i32_0 = arith.constant 0 : i32
    return %c0_i32, %arg0 : i32, i32
  }
  func.func @transform_1(%arg0: i32) -> (i32, i32) {
    %c0_i32 = arith.constant 0 : i32
    %c0_i32_0 = arith.constant 0 : i32
    %c0_i32_1 = arith.constant 0 : i32
    return %c0_i32, %c0_i32_0 : i32, i32
  }
  func.func @transform_2(%arg0: i32) -> (i32, i32) {
    %c0_i32 = arith.constant 0 : i32
    %c0_i32_0 = arith.constant 0 : i32
    %c0_i32_1 = arith.constant 0 : i32
    return %c0_i32, %c0_i32_0 : i32, i32
  }
  func.func @transform_3(%arg0: i32) -> (i32, i32) {
    %c0_i32 = arith.constant 0 : i32
    %c0_i32_0 = arith.constant 0 : i32
    %c0_i32_1 = arith.constant 0 : i32
    return %c0_i32, %c0_i32_0 : i32, i32
  }
  func.func @transform_4(%arg0: i32) -> (i32, i32) {
    %c0_i32 = arith.constant 0 : i32
    %c0_i32_0 = arith.constant 0 : i32
    %c0_i32_1 = arith.constant 0 : i32
    return %c0_i32, %c0_i32_0 : i32, i32
  }
  func.func @transform_5(%arg0: i32) -> (i32, i32) {
    %c0_i32 = arith.constant 0 : i32
    %c0_i32_0 = arith.constant 0 : i32
    %c0_i32_1 = arith.constant 0 : i32
    return %c0_i32, %c0_i32_0 : i32, i32
  }
  func.func @transform_6(%arg0: i32) -> (i32, i32) {
    %c0_i32 = arith.constant 0 : i32
    %c0_i32_0 = arith.constant 0 : i32
    %c0_i32_1 = arith.constant 0 : i32
    return %c0_i32, %c0_i32_0 : i32, i32
  }
  func.func @transform_7(%arg0: i32) -> (i32, i32) {
    %c0_i32 = arith.constant 0 : i32
    %c0_i32_0 = arith.constant 0 : i32
    return %c0_i32, %arg0 : i32, i32
  }
}

</mosaic_0001>

<bundles_post_ra>
// kernel: actor_forward.1
= control target key start
LH: loop header
LB: loop body
LE: loop exit
PB: predicated region body
PF: predicated region fallthrough
CT: control target
= control target key end

     0   :  { %12 = vsyncpa [#allocation4], 0  ;;  %s1454_s0 = inlined_call_operand.vmem [shape: f32[32,256], index: 0, kind: input, shape index: {}]   ;;  %s1455_s1 = inlined_call_operand.vmem [shape: f32[64,32], index: 1, kind: input, shape index: {}]   ;;  %s1456_s2 = inlined_call_operand.vmem [shape: f32[64,1], index: 2, kind: input, shape index: {}]   ;;  %s1457_s3 = inlined_call_operand.vmem [shape: f32[64,64], index: 3, kind: input, shape index: {}]   ;;  %s1458_s4 = inlined_call_operand.vmem [shape: f32[64,1], index: 4, kind: input, shape index: {}]   ;;  %s1459_s5 = inlined_call_operand.vmem [shape: f32[16,64], index: 5, kind: input, shape index: {}]   ;;  %s1460_s6 = inlined_call_operand.vmem [shape: f32[16,1], index: 6, kind: input, shape index: {}]   ;;  %s1461_s7 = inlined_call_operand.hbm [shape: f32[16,256], index: 7, kind: output, shape index: {}]  }
   0x1   :  { %14 = vsyncpa [#allocation4 + $0x1], 0  ;;  %s1217_s24 = smov 0   ;;  %s1219_s25 = smov 0  }
   0x2   :  { %s1221_s26 = smov 0   ;;  %s1223_s27 = smov 0  }
   0x3 LB: > { %s923_s28 = sadd.s32 4294967295, %s1170_s27   ;;  %s924_s29 = sadd.s32 4294967294, %s1170_s27   ;;  %s1170_s27 = sphi %s1223_s27, %s1467_s27   ;;  %s1166_s26 = sphi %s1221_s26, %s1466_s26   ;;  %s1162_s25 = sphi %s1219_s25, %s1465_s25   ;;  %s1158_s24 = sphi %s1217_s24, %s1464_s24  }
   0x4   : > { %s1240_s30 = sadd.s32 1, %s1170_s27   ;;  %s27_s8 = sadd.s32 1, %s1166_s26 }
   0x5   : > { %s24_s9 = ssub.s32 %s1170_s27, %s1240_s30  ;;  %p34_p0 = scmp.ne.s32.totalorder %s1166_s26, %s1162_s25 }
   0x6   : > { %p25_p1 = scmp.eq.s32.totalorder %s24_s9, 0  ;;  %p35_p2 = scmp.eq.s32.totalorder %s1170_s27, 0 }
   0x7   : > { %p190_p3 = scmp.eq.s32.totalorder %s923_s28, 1  ;;  %p195_p4 = scmp.ne.s32.totalorder %s1162_s25, %s1158_s24 }
   0x8   : > { %s1253_s10 = scalar_select %p25_p1, %s1166_s26, %s27_s8  }
   0x9   : > { %p36_p5 = por %p35_p2, %p34_p0  ;;  %p1255_p6 = por %p190_p3, %p34_p0 }
   0xa   : > { %p196_p7 = scmp.eq.s32.totalorder %s924_s29, 1  ;;  %p926_p9 = scmp.ge.s32.totalorder %s1170_s27, 2 }
   0xc   : > { %p1259_p8 = por %p196_p7, %p195_p4  ;;  %230 = sbr.rel (%p926_p9) target bundleno = 23 (0x17), region = 40 }
  0x11   : > { %233 = sbr.rel (!%p36_p5) target bundleno = 23 (0x17), region = 44  ;;  %s235_s13 = sand.u32 (%p36_p5), 1, %s1166_s26  }
  0x12   : > { %s928_s14 = sshll.u32 (%p36_p5), %s1170_s27, 3  ;;  %s927_s15 = sshll.u32 (%p36_p5), %s235_s13, 5 }
  0x13   : > { %s239_s18 = scalar_lea.vmem (%p36_p5), %s1454_s0, %s928_s14  ;;  %s237_s19 = scalar_lea.vmem (%p36_p5), [#allocation2], %s927_s15 }
  0x14   : > { %v274_v0 = vld [vmem:[%s239_s18] sm:$0xff] (%p36_p5)  ;;  %v276_v1 = vld [vmem:[%s239_s18 + $0x10] sm:$0xff] (%p36_p5) }
  0x15   : > { %v278_v2 = vld [vmem:[%s239_s18 + $0x20] sm:$0xff] (%p36_p5)  ;;  %275 = vst [vmem:[%s237_s19] sm:$0xff] (%p36_p5), %v274_v0  ;;  %277 = vst [vmem:[%s237_s19 + $0x8] sm:$0xff] (%p36_p5), %v276_v1  ;;  %v280_v3 = vld [vmem:[%s239_s18 + $0x30] sm:$0xff] (%p36_p5) }
  0x16   : > { %279 = vst [vmem:[%s237_s19 + $0x10] sm:$0xff] %v278_v2  ;;  %281 = vst [vmem:[%s237_s19 + $0x18] sm:$0xff] %v280_v3 }
  0x17 PF: > { %p929_p10 = scmp.ge.s32.totalorder %s1170_s27, 1  ;;  %p286_p11 = scmp.lt.s32.totalorder %s1170_s27, 3 }
  0x19   : > { %p287_p12 = pnand %p929_p10, %p286_p11 }
  0x1a   : > { %s1274_s20 = sand.u32 (!%p287_p12), 1, %s1162_s25   ;;  %s951_s19 = sshll.u32 (!%p287_p12), %s923_s28, 7 }
  0x1b   : > { %290 = sbr.rel (%p287_p12) target bundleno = 778 (0x30a), region = 82  ;;  %s930_s23 = sshll.u32 (!%p287_p12), %s1274_s20, 5 }
  0x1c   : > { %s295_s9 = scalar_lea.vmem (!%p287_p12), [#allocation2], %s930_s23  ;;  %s931_s16 = sshll.u32 (!%p287_p12), %s1274_s20, 4 }
  0x1d   : > { %s323_s17 = scalar_lea.vmem (!%p287_p12), [#allocation3], %s931_s16  ;;  %s1411_s23 = scalar_lea.hbm (!%p287_p12), %s1461_s7, %s951_s19 }
  0x1e   : > { %s856_s18 = sshll.u32 (!%p287_p12), %s323_s17, 4  ;;  %s844_s29 = scalar_lea.sflag (!%p287_p12), [#allocation4], %s1274_s20  ;;  %s1406_s18 = int_to_ptr.vmem [resolvable:$true] %s856_s18 }
  0x1f   : > { %s1110_s8 = scalar_lea.vmem (!%p287_p12), %s1406_s18, 256  ;;  %s1173_s28 = smov (!%p287_p12), [#allocation3]  }
  0x20   : > { %v324_v4 = vld [vmem:[%s1455_s1] sm:$0xff]  ;;  %vm384_vm0 = vcmask 261120   ;;  %v1172_v5 = vmov 0   ;;  %v343_v6 = vld [vmem:[%s1456_s2 + $0x38] sm:$0xff]  ;;  %v334_v8 = vld [vmem:[%s295_s9 + $0x10] sm:$0xff]  ;;  %vm578_vm1 = vcmask 523264   ;;  %p1111_p13 = scmp.ne.s32.totalorder %s1406_s18, %s1110_s8 }
  0x21   : > { %1000 = vmatprep.mubr.msk.f32.mxu0 %vm384_vm0, %v324_v4  ;;  %1102 = vset.pattern.permute.xlu0 %v1172_v5  ;;  %v335_v7 = vld [vmem:[%s295_s9 + $0x18] sm:$0xff]  ;;  %v342_v9 = vld [vmem:[%s1456_s2 + $0x30] sm:$0xff]  ;;  %v341_v10 = vld [vmem:[%s1456_s2 + $0x28] sm:$0xff]  ;;  %s1114_s13 = sshll.u32 %s1173_s28, 4  ;;  %s1115_s13 = int_to_ptr.vmem [resolvable:$false] %s1114_s13 }
  0x22   : > { %1103 = vset.pattern.permute.xlu1 %v1172_v5  ;;  %381 = vperm.xlu0 %1102, %v343_v6   ;;  %v333_v11 = vld [vmem:[%s295_s9 + $0x8] sm:$0xff]  ;;  %v340_v12 = vld [vmem:[%s1456_s2 + $0x20] sm:$0xff]  ;;  %v339_v14 = vld [vmem:[%s1456_s2 + $0x18] sm:$0xff]  ;;  %p1112_p0 = pnand %p1111_p13, %p1255_p6  ;;  %s1116_s14 = scalar_lea.vmem %s1115_s13, 512 }
  0x23   : > { %992 = vmatprep.subr.mxu0 %v335_v7  ;;  %371 = vperm.xlu1 %1103, %v341_v10   ;;  %v332_v13 = vld [vmem:[%s295_s9] sm:$0xff]  ;;  %v325_v15 = vld [vmem:[%s1455_s1 + $0x8] sm:$0xff]  ;;  %v326_v16 = vld [vmem:[%s1455_s1 + $0x10] sm:$0xff]  ;;  %p1117_p2 = scmp.lt.s32.totalorder %s1406_s18, %s1115_s13  ;;  %p1118_p3 = scmp.lt.s32.totalorder %s1116_s14, %s1110_s8 }
  0x24   : > { %993 = vmatpush3.msra.mxu0 %v335_v7  ;;  %v338_v17 = vld [vmem:[%s1456_s2 + $0x10] sm:$0xff]  ;;  %v337_v18 = vld [vmem:[%s1456_s2 + $0x8] sm:$0xff]  ;;  %v327_v19 = vld [vmem:[%s1455_s1 + $0x18] sm:$0xff]  ;;  %p1113_p1 = pneg %p1112_p0 }
  0x25   : > { %994 = vmatprep.subr.mxu0 %v334_v8  ;;  %v328_v20 = vld [vmem:[%s1455_s1 + $0x20] sm:$0xff]  ;;  %v537_v22 = vld [vmem:[%s1458_s4 + $0x38] sm:$0xff]  ;;  %v329_v23 = vld [vmem:[%s1455_s1 + $0x28] sm:$0xff]  ;;  %p1119_p4 = por %p1118_p3, %p1117_p2 }
  0x26   : > { %995 = vmatpush3.msra.mxu0 %v334_v8  ;;  %376 = vperm.xlu0 %1102, %v342_v9   ;;  %v336_v21 = vld [vmem:[%s1456_s2] sm:$0xff]  ;;  %v330_v24 = vld [vmem:[%s1455_s1 + $0x30] sm:$0xff]  ;;  %v535_v26 = vld [vmem:[%s1458_s4 + $0x28] sm:$0xff] }
  0x27   : > { %996 = vmatprep.subr.mxu0 %v333_v11  ;;  %366 = vperm.xlu1 %1103, %v340_v12   ;;  %v536_v25 = vld [vmem:[%s1458_s4 + $0x30] sm:$0xff]  ;;  %v331_v27 = vld [vmem:[%s1455_s1 + $0x38] sm:$0xff]  ;;  %v534_v28 = vld [vmem:[%s1458_s4 + $0x20] sm:$0xff]  ;;  %p1120_p5 = pnand %p1119_p4, %p1113_p1 }
  0x28   : > { %997 = vmatpush3.msra.mxu0 %v333_v11  ;;  %v533_v29 = vld [vmem:[%s1458_s4 + $0x18] sm:$0xff]  ;;  %v532_v30 = vld [vmem:[%s1458_s4 + $0x10] sm:$0xff]  ;;  %v531_v31 = vld [vmem:[%s1458_s4 + $0x8] sm:$0xff] }
  0x29   : > { %998 = vmatprep.subr.mxu0 %v332_v13  ;;  %v530_v32 = vld [vmem:[%s1458_s4] sm:$0xff]  ;;  %v719_v34 = vld [vmem:[%s1460_s6 + $0x8] sm:$0xff]  ;;  %v524_v5 = vld [vmem:[%s1457_s3 + $0x10] sm:$0xff] }
  0x2a   : > { %999 = vmatpush3.msra.mxu0 %v332_v13  ;;  %361 = vperm.xlu0 %1102, %v339_v14   ;;  %v718_v33 = vld [vmem:[%s1460_s6] sm:$0xff]  ;;  %v523_v4 = vld [vmem:[%s1457_s3 + $0x8] sm:$0xff]  ;;  %v525_v6 = vld [vmem:[%s1457_s3 + $0x18] sm:$0xff] }
  0x2b   : > { %1001 = vmatmul.mubr.msk.f32.vlgmr.msra.gmra.mxu0 %vm384_vm0, %v325_v15  ;;  %356 = vperm.xlu1 %1103, %v338_v17   ;;  %v522_v35 = vld [vmem:[%s1457_s3] sm:$0xff]  ;;  %v527_v8 = vld [vmem:[%s1457_s3 + $0x28] sm:$0xff]  ;;  %v528_v9 = vld [vmem:[%s1457_s3 + $0x30] sm:$0xff] }
  0x2c   : > { %1003 = vmatprep.mubr.msk.f32.mxu0 %vm384_vm0, %v326_v16  ;;  %1028 = vmatprep.mubr.msk.f32.mxu1 %vm578_vm1, %v522_v35  ;;  %v526_v7 = vld [vmem:[%s1457_s3 + $0x20] sm:$0xff]  ;;  %v529_v10 = vld [vmem:[%s1457_s3 + $0x38] sm:$0xff] }
  0x2d   : > { %v716_v11 = vld [vmem:[%s1459_s5] sm:$0xff] }
  0x2e   : > { %351 = vperm.xlu0 %1102, %v337_v18  }
  0x2f   : > { %1004 = vmatmul.mubr.msk.f32.gmra.mxu0 %vm384_vm0, %v327_v19  ;;  %346 = vperm.xlu1 %1103, %v336_v21  }
  0x30   : > { %1006 = vmatprep.mubr.msk.f32.mxu0 %vm384_vm0, %v328_v20 }
  0x32   : > { %575 = vperm.xlu0 %1102, %v537_v22  }
  0x33   : > { %1007 = vmatmul.mubr.msk.f32.gmra.mxu0 %vm384_vm0, %v329_v23  ;;  %570 = vperm.xlu1 %1103, %v536_v25  }
  0x34   : > { %1009 = vmatprep.mubr.msk.f32.mxu0 %vm384_vm0, %v330_v24 }
  0x36   : > { %565 = vperm.xlu0 %1102, %v535_v26  }
  0x37   : > { %1010 = vmatmul.mubr.msk.f32.gmra.mxu0 %vm384_vm0, %v331_v27  ;;  %560 = vperm.xlu1 %1103, %v534_v28  }
  0x38   : > { %1056 = vmatprep.mubr.msk.f32.mxu0 %vm578_vm1, %v716_v11 }
  0x3a   : > { %555 = vperm.xlu0 %1102, %v533_v29  }
  0x3b   : > { %550 = vperm.xlu1 %1103, %v532_v30  }
  0x3e   : > { %545 = vperm.xlu0 %1102, %v531_v31  }
  0x3f   : > { %540 = vperm.xlu1 %1103, %v530_v32  }
  0x42   : > { %722 = vperm.xlu0 %1102, %v718_v33  }
  0x43   : > { %727 = vperm.xlu1 %1103, %v719_v34  }
  0x9d   : > { %v382_v38 = vpop.permute.xlu0 %381 }
  0x9e   : > { %v372_v40 = vpop.permute.xlu1 %371 }
  0xa1   : > { %v377_v43 = vpop.permute.xlu0 %376 }
  0xa2   : > { %v367_v45 = vpop.permute.xlu1 %366 }
  0xa5   : > { %v362_v52 = vpop.permute.xlu0 %361 }
  0xa6   : > { %v357_v55 = vpop.permute.xlu1 %356 }
  0xa9   : > { %v352_v60 = vpop.permute.xlu0 %351 }
  0xaa   : > { %v347_v63 = vpop.permute.xlu1 %346 }
  0xad   : > { %v576_v14 = vpop.permute.xlu0 %575 }
  0xae   : > { %v571_v16 = vpop.permute.xlu1 %570 }
  0xb1   : > { %v566_v19 = vpop.permute.xlu0 %565 }
  0xb2   : > { %v561_v21 = vpop.permute.xlu1 %560 }
  0xb5   : > { %v556_v28 = vpop.permute.xlu0 %555 }
  0xb6   : > { %v551_v31 = vpop.permute.xlu1 %550 }
  0xeb   : > { %v1002_v36 = vpop.f32.mrf.mxu0 }
  0xec   : > { %v481_v61 = vadd.f32 %v1002_v36, %v352_v60  ;;  %v546_v36 = vpop.permute.xlu0 %545 }
  0xed   : > { %v475_v37 = vpop.f32.mrf.mxu0 }
  0xee   : > { %v476_v0 = vadd.f32 %v475_v37, %v347_v63  ;;  %v515_v2 = vmax.f32 %v481_v61, 0.0 }
  0xef   : > { %v1005_v39 = vpop.f32.mrf.mxu0 }
  0xf0   : > { %v491_v56 = vadd.f32 %v1005_v39, %v362_v52  ;;  %v514_v3 = vmax.f32 %v476_v0, 0.0  ;;  %v541_v39 = vpop.permute.xlu1 %540 }
  0xf1   : > { %v485_v41 = vpop.f32.mrf.mxu0 }
  0xf2   : > { %v486_v58 = vadd.f32 %v485_v41, %v357_v55  ;;  %v517_v62 = vmax.f32 %v491_v56, 0.0 }
  0xf3   : > { %v1008_v42 = vpop.f32.mrf.mxu0 }
  0xf4   : > { %v501_v49 = vadd.f32 %v1008_v42, %v372_v40  ;;  %v516_v1 = vmax.f32 %v486_v58, 0.0 }
  0xf5   : > { %v495_v44 = vpop.f32.mrf.mxu0 }
  0xf6   : > { %v496_v53 = vadd.f32 %v495_v44, %v367_v45  ;;  %v519_v57 = vmax.f32 %v501_v49, 0.0  ;;  %v717_v44 = vld [vmem:[%s1459_s5 + $0x8] sm:$0xff] }
  0xf7   : > { %v1011_v46 = vpop.f32.mrf.mxu0 }
  0xf8   : > { %v511_v47 = vadd.f32 %v1011_v46, %v382_v38  ;;  %v518_v59 = vmax.f32 %v496_v53, 0.0  ;;  %v723_v46 = vpop.permute.xlu0 %722 }
  0xf9   : > { %v505_v48 = vpop.f32.mrf.mxu0 }
  0xfa   : > { %v521_v50 = vmax.f32 %v511_v47, 0.0  ;;  %v506_v51 = vadd.f32 %v505_v48, %v377_v43  ;;  %v728_v47 = vpop.permute.xlu1 %727 }
  0xfc   : > { %v520_v54 = vmax.f32 %v506_v51, 0.0  ;;  %1012 = vmatprep.subr.mxu1 %v521_v50 }
  0xfd   : > { %1013 = vmatpush3.msra.mxu1 %v521_v50 }
  0xfe   : > { %1014 = vmatprep.subr.mxu1 %v520_v54 }
  0xff   : > { %1015 = vmatpush3.msra.mxu1 %v520_v54 }
 0x100   : > { %1016 = vmatprep.subr.mxu1 %v519_v57 }
 0x101   : > { %1017 = vmatpush3.msra.mxu1 %v519_v57 }
 0x102   : > { %1018 = vmatprep.subr.mxu1 %v518_v59 }
 0x103   : > { %1019 = vmatpush3.msra.mxu1 %v518_v59 }
 0x104   : > { %1020 = vmatprep.subr.mxu1 %v517_v62 }
 0x105   : > { %1021 = vmatpush3.msra.mxu1 %v517_v62 }
 0x106   : > { %1022 = vmatprep.subr.mxu1 %v516_v1 }
 0x107   : > { %1023 = vmatpush3.msra.mxu1 %v516_v1 }
 0x108   : > { %1024 = vmatprep.subr.mxu1 %v515_v2 }
 0x109   : > { %1025 = vmatpush3.msra.mxu1 %v515_v2 }
 0x10a   : > { %1026 = vmatprep.subr.mxu1 %v514_v3 }
 0x10b   : > { %1027 = vmatpush3.msra.mxu1 %v514_v3 }
 0x10c   : > { %1029 = vmatmul.mubr.msk.f32.vlgmr.msra.gmra.mxu1 %vm578_vm1, %v523_v4 }
 0x10d   : > { %1031 = vmatprep.mubr.msk.f32.mxu1 %vm578_vm1, %v524_v5 }
 0x110   : > { %1032 = vmatmul.mubr.msk.f32.gmra.mxu1 %vm578_vm1, %v525_v6 }
 0x111   : > { %1034 = vmatprep.mubr.msk.f32.mxu1 %vm578_vm1, %v526_v7 }
 0x114   : > { %1035 = vmatmul.mubr.msk.f32.gmra.mxu1 %vm578_vm1, %v527_v8 }
 0x115   : > { %1037 = vmatprep.mubr.msk.f32.mxu1 %vm578_vm1, %v528_v9 }
 0x118   : > { %1038 = vmatmul.mubr.msk.f32.gmra.mxu1 %vm578_vm1, %v529_v10 }
 0x1cc   : > { %v1030_v12 = vpop.f32.mrf.mxu1 }
 0x1cd   : > { %v675_v37 = vadd.f32 %v1030_v12, %v546_v36 }
 0x1ce   : > { %v669_v13 = vpop.f32.mrf.mxu1 }
 0x1cf   : > { %v670_v40 = vadd.f32 %v669_v13, %v541_v39  ;;  %v709_v42 = vmax.f32 %v675_v37, 0.0 }
 0x1d0   : > { %v1033_v15 = vpop.f32.mrf.mxu1 }
 0x1d1   : > { %v685_v32 = vadd.f32 %v1033_v15, %v556_v28  ;;  %v708_v43 = vmax.f32 %v670_v40, 0.0 }
 0x1d2   : > { %v679_v17 = vpop.f32.mrf.mxu1 }
 0x1d3   : > { %v680_v34 = vadd.f32 %v679_v17, %v551_v31  ;;  %v711_v38 = vmax.f32 %v685_v32, 0.0 }
 0x1d4   : > { %v1036_v18 = vpop.f32.mrf.mxu1 }
 0x1d5   : > { %v695_v25 = vadd.f32 %v1036_v18, %v566_v19  ;;  %v710_v41 = vmax.f32 %v680_v34, 0.0 }
 0x1d6   : > { %v689_v20 = vpop.f32.mrf.mxu1 }
 0x1d7   : > { %v690_v29 = vadd.f32 %v689_v20, %v561_v21  ;;  %v713_v33 = vmax.f32 %v695_v25, 0.0 }
 0x1d8   : > { %v1039_v22 = vpop.f32.mrf.mxu1 }
 0x1d9   : > { %v705_v23 = vadd.f32 %v1039_v22, %v576_v14  ;;  %v712_v35 = vmax.f32 %v690_v29, 0.0 }
 0x1da   : > { %v699_v24 = vpop.f32.mrf.mxu1 }
 0x1db   : > { %v715_v26 = vmax.f32 %v705_v23, 0.0  ;;  %v700_v27 = vadd.f32 %v699_v24, %v571_v16 }
 0x1dd   : > { %v714_v30 = vmax.f32 %v700_v27, 0.0  ;;  %1040 = vmatprep.subr.mxu0 %v715_v26 }
 0x1de   : > { %1041 = vmatpush3.msra.mxu0 %v715_v26 }
 0x1df   : > { %1042 = vmatprep.subr.mxu0 %v714_v30 }
 0x1e0   : > { %1043 = vmatpush3.msra.mxu0 %v714_v30 }
 0x1e1   : > { %1044 = vmatprep.subr.mxu0 %v713_v33 }
 0x1e2   : > { %1045 = vmatpush3.msra.mxu0 %v713_v33 }
 0x1e3   : > { %1046 = vmatprep.subr.mxu0 %v712_v35 }
 0x1e4   : > { %1047 = vmatpush3.msra.mxu0 %v712_v35 }
 0x1e5   : > { %1048 = vmatprep.subr.mxu0 %v711_v38 }
 0x1e6   : > { %1049 = vmatpush3.msra.mxu0 %v711_v38 }
 0x1e7   : > { %1050 = vmatprep.subr.mxu0 %v710_v41 }
 0x1e8   : > { %1051 = vmatpush3.msra.mxu0 %v710_v41 }
 0x1e9   : > { %1052 = vmatprep.subr.mxu0 %v709_v42 }
 0x1ea   : > { %1053 = vmatpush3.msra.mxu0 %v709_v42 }
 0x1eb   : > { %1054 = vmatprep.subr.mxu0 %v708_v43 }
 0x1ec   : > { %1055 = vmatpush3.msra.mxu0 %v708_v43 }
 0x1ed   : > { %1057 = vmatmul.mubr.msk.f32.vlgmr.msra.gmra.mxu0 %vm578_vm1, %v717_v44 }
 0x2ad   : > { %v1058_v45 = vpop.f32.mrf.mxu0 }
 0x2ae   : > { %v808_v49 = vadd.f32 %v1058_v45, %v728_v47 }
 0x2af   : > { %v802_v48 = vpop.f32.mrf.mxu0 }
 0x2b0   : > { %v803_v50 = vadd.f32 %v802_v48, %v723_v46 }
 0x2b2   : > { %v811_v51 = vmax.f32 %v803_v50, %v808_v49 }
 0x2b4   : > { %v812_v52 = vrot.slane %v811_v51, 4 }
 0x2b6   : > { %v813_v53 = vmax.f32 %v811_v51, %v812_v52 }
 0x2b8   : > { %v814_v54 = vrot.slane %v813_v53, 2 }
 0x2ba   : > { %v815_v55 = vmax.f32 %v813_v53, %v814_v54 }
 0x2bc   : > { %v816_v56 = vrot.slane %v815_v55, 1 }
 0x2be   : > { %v817_v57 = vmax.f32 %v815_v55, %v816_v56 }
 0x2c0   : > { %v818_v58 = vsub.f32 %v803_v50, %v817_v57  ;;  %v819_v59 = vsub.f32 %v808_v49, %v817_v57 }
 0x2c2   : > { %v820_v60 = vmul.f32 1.442695, %v818_v58  ;;  %v822_v61 = vmul.f32 1.442695, %v819_v59 }
 0x2c4   : > { %1104 = vpow2.f32 %v820_v60 }
 0x2c5   : > { %1106 = vpow2.f32 %v822_v61 }
 0x2d1   : > { %v1105_v62 = vpop.eup %1104 }
 0x2d2   : > { %v1107_v63 = vpop.eup %1106 }
 0x2d3   : > { %v824_v0 = vadd.f32 %v1107_v63, %v1105_v62 }
 0x2d5   : > { %v825_v1 = vrot.slane %v824_v0, 4 }
 0x2d7   : > { %v826_v2 = vadd.f32 %v825_v1, %v824_v0 }
 0x2d9   : > { %v827_v3 = vrot.slane %v826_v2, 2 }
 0x2db   : > { %v828_v4 = vadd.f32 %v827_v3, %v826_v2 }
 0x2dd   : > { %v829_v5 = vrot.slane %v828_v4, 1 }
 0x2df   : > { %v830_v6 = vadd.f32 %v829_v5, %v828_v4 }
 0x2e1   : > { %1108 = vrcp.f32 %v830_v6 }
 0x2ee   : > { %v1109_v7 = vpop.eup %1108 }
 0x2ef   : > { %v832_v8 = vmul.f32 %v1109_v7, %v830_v6 }
 0x2f1   : > { %v833_v9 = vsub.f32 2.0, %v832_v8 }
 0x2f3   : > { %v834_v10 = vmul.f32 %v1109_v7, %v833_v9 }
 0x2f5   : > { %v835_v11 = vmul.f32 %v1105_v62, %v834_v10  ;;  %v836_v12 = vmul.f32 %v1107_v63, %v834_v10 }
 0x2f7   : > { %v837_v13 = vmax.f32 %v835_v11, 1e-20  ;;  %v838_v14 = vmax.f32 %v836_v12, 1e-20 }
 0x2f9   : > { %v839_v15 = vmin.f32 %v837_v13, 1.0  ;;  %v840_v16 = vmin.f32 %v838_v14, 1.0 }
 0x2fb   : > { %841 = vst [vmem:[%s323_s17] sm:$0xff] %v839_v15  ;;  %842 = vst [vmem:[%s323_s17 + $0x8] sm:$0xff] %v840_v16 }
 0x2fc   : > { %1123 = shalt.err (!%p1120_p5)
}
 0x2fd   : > { %s1124_s9 = scalar_lea.hbm %s1411_s23, 256  ;;  %s1128_s17 = scalar_lea.hbm %s1461_s7, 512 }
 0x2fe   : > { %p1125_p7 = scmp.ne.s32.totalorder %s1411_s23, %s1124_s9  ;;  %p1129_p12 = scmp.lt.s32.totalorder %s1411_s23, %s1461_s7 }
 0x2ff   : > { %p1130_p13 = scmp.lt.s32.totalorder %s1128_s17, %s1124_s9 }
 0x300   : > { %p1126_p10 = pnand %p1125_p7, %p1255_p6 }
 0x301   : > { %p1131_p0 = por %p1130_p13, %p1129_p12 }
 0x302   : > { %p1127_p11 = pneg %p1126_p10 }
 0x304   : > { %p1132_p1 = pnand %p1131_p0, %p1127_p11 }
 0x306   : > { %1135 = shalt.err (!%p1132_p1)
}
 0x307   : > { %s1174_s22 = smov 128   ;;  %s1175_s8 = smov 256  }
 0x308   : > { %s1176_s28 = smov 8  }
 0x309   : > { %1059 = dma.vmem_to_hbm [thread:$0]  (%p1255_p6), %s1406_s18, 256, %s1411_s23, %s844_s29, %s1174_s22, %s1175_s8, %s1176_s28  }
 0x30a PF: > { %s871_s13 = sand.u32 1, %s1158_s24   ;;  %p1062_p2 = pnand %p926_p9, %p1259_p8 }
 0x30b   : > { %s872_s14 = scalar_lea.sflag [#allocation4], %s871_s13 }
 0x30c   : > { %p1063_p3 = pneg %p1062_p2 }
 0x30e   : > { %1153 = dma.done.wait (%p1063_p3), %s872_s14, 256  }
 0x30f   : > { %1155 = vsyncadd (%p1063_p3), %s872_s14, 4294967040  ;;  %p17_p4 = scmp.ge.s32.totalorder %s1240_s30, 4   ;;  %s1464_s24 = smov %s1162_s25 }
 0x310   : > { %s1465_s25 = smov %s1166_s26  ;;  %s1466_s26 = smov %s1253_s10 }
 0x311   : > { %s1467_s27 = smov %s1240_s30  ;;  %19 = sbr.rel (!%p17_p4) target bundleno = 3 (0x3), region = 126 }
 0x316   :  { %877 = vsyncpa [#allocation4], 1 }
 0x317   :  { %879 = vsyncpa [#allocation4 + $0x1], 1 }

</bundles_post_ra>
